<compile_context>
chip_gen: v6e
topology: v6e:2x2x1
jax: 0.10.0
libtpu: 0.0.40
codegen_flags: <defaults>
</compile_context>

<pallas_src>
import collections
import functools
import math

import jax
import jax.numpy as jnp
import numpy as np
from jax.experimental import pallas as pl
from jax.experimental.pallas import tpu as pltpu  # noqa: F401  (TPU backend)

CONTRASTIVE_LOSS_COEF = 0.05
DIVERSITY_LOSS_COEF = 0.02
Q_LOSS_COEF = 0.01
LN_EPS = 1e-5


# ----------------------------- kernel helpers -------------------------------

def _ln(z, g, b):
    mu = jnp.mean(z, axis=-1, keepdims=True)
    var = jnp.mean((z - mu) ** 2, axis=-1, keepdims=True)
    return (z - mu) * jax.lax.rsqrt(var + LN_EPS) * g + b


def _gelu(z):
    # exact (erf-based) GELU, matching PyTorch nn.GELU() / F.gelu default
    return 0.5 * z * (1.0 + jax.lax.erf(z / math.sqrt(2.0)))


# ----------------------------- Pallas kernels ------------------------------

def _embed_norm_kernel(e_ref, pe_ref, g_ref, b_ref, o_ref, *, scale):
    # x = LayerNorm(emb * sqrt(E) + pe)
    B, S, E = e_ref.shape
    x = e_ref[...] * scale + pe_ref[...]              # (B,S,E) + (1,S,E)
    x = x.reshape(B * S, E)
    y = _ln(x, g_ref[...], b_ref[...])
    o_ref[...] = y.reshape(B, S, E)


def _expert_layer_kernel(x_ref, n1g_ref, n1b_ref, inw_ref, inb_ref,
                         outw_ref, outb_ref, gwx_ref, gwa_ref, gb_ref,
                         gng_ref, gnb_ref, n2g_ref, n2b_ref,
                         w1_ref, b1_ref, w2_ref, b2_ref, tag_ref, o_ref,
                         *, nhead, add_tag):
    """One full pre-norm expert layer (GatedAttention block + FFN block) fused."""
    A, S, E = x_ref.shape
    hd = E // nhead
    scale = 1.0 / math.sqrt(hd)

    x = x_ref[...].reshape(A * S, E)

    # ---- GatedAttention on y = LN1(x) ----
    y = _ln(x, n1g_ref[...], n1b_ref[...])
    qkv = jnp.dot(y, inw_ref[...], preferred_element_type=jnp.float32) + inb_ref[...]
    outw = outw_ref[...]

    # per-head attention; out-projection accumulated per head (no concat / no k.T)
    attn = jnp.zeros((A * S, E), jnp.float32)
    for h in range(nhead):
        qh = qkv[:, h * hd:(h + 1) * hd].reshape(A, S, hd)
        kh = qkv[:, E + h * hd:E + (h + 1) * hd].reshape(A, S, hd)
        vh = qkv[:, 2 * E + h * hd:2 * E + (h + 1) * hd].reshape(A, S, hd)
        s = jnp.einsum('aqd,akd->aqk', qh, kh,
                       preferred_element_type=jnp.float32) * scale
        s = s - jnp.max(s, axis=-1, keepdims=True)
        p = jnp.exp(s)
        p = p / jnp.sum(p, axis=-1, keepdims=True)
        oh = jnp.einsum('aqk,akd->aqd', p, vh,
                        preferred_element_type=jnp.float32)       # (A,S,hd)
        attn = attn + jnp.dot(oh.reshape(A * S, hd),
                              outw[h * hd:(h + 1) * hd, :],
                              preferred_element_type=jnp.float32)
    attn = attn + outb_ref[...]

    # gate(cat([y, attn])) == y @ Wg[:E] + attn @ Wg[E:] + bg  (weights pre-split)
    z = (jnp.dot(y, gwx_ref[...], preferred_element_type=jnp.float32)
         + jnp.dot(attn, gwa_ref[...], preferred_element_type=jnp.float32)
         + gb_ref[...])
    gated = jax.nn.sigmoid(z) * attn
    x = x + _ln(y + gated, gng_ref[...], gnb_ref[...])            # residual 1 (fused)

    # ---- FFN block ----
    y2 = _ln(x, n2g_ref[...], n2b_ref[...])
    h1 = _gelu(jnp.dot(y2, w1_ref[...], preferred_element_type=jnp.float32)
               + b1_ref[...])
    x = x + (jnp.dot(h1, w2_ref[...], preferred_element_type=jnp.float32)
             + b2_ref[...])                                       # residual 2 (fused)

    if add_tag:
        x = x + tag_ref[...]                                      # expert tag (last layer)

    o_ref[...] = x.reshape(A, S, E)


def _router_kernel(x_ref, v_ref, w1_ref, b1_ref, w2_ref, b2_ref,
                   qv_ref, ng_ref, nb_ref, logit_ref, prob_ref, *, max_visits):
    """Fused router: summary mean + MLP + q_values + LN + clip + visit mask + softmax."""
    x = x_ref[...]                                                # (A,S,E)
    summary = jnp.mean(x, axis=1)                                 # (A,E)
    h = jnp.dot(summary, w1_ref[...], preferred_element_type=jnp.float32) + b1_ref[...]
    h = _gelu(h)
    logits = jnp.dot(h, w2_ref[...], preferred_element_type=jnp.float32) + b2_ref[...]
    fl = _ln(logits + qv_ref[...], ng_ref[...], nb_ref[...])
    fl = jnp.clip(fl, -10.0, 10.0)
    fl = jnp.where(v_ref[...] >= max_visits, -jnp.inf, fl)        # terminate col never masked
    logit_ref[...] = fl
    s = fl - jnp.max(fl, axis=-1, keepdims=True)
    p = jnp.exp(s)
    prob_ref[...] = p / jnp.sum(p, axis=-1, keepdims=True)


def _final_head_kernel(x_ref, g_ref, b_ref, w_ref, bo_ref, o_ref):
    # final_norm(mean over seq) @ lm_head  (lm head padded to 128 lanes)
    x = x_ref[...]                                                # (B,S,E)
    s = jnp.mean(x, axis=1)                                       # (B,E)
    sn = _ln(s, g_ref[...], b_ref[...])
    o_ref[...] = jnp.dot(sn, w_ref[...], preferred_element_type=jnp.float32) + bo_ref[...]


# --------------------------- kernel call wrappers ----------------------------

def embed_norm(emb, pe, g, b, scale):
    B, S, E = emb.shape
    return pl.pallas_call(
        functools.partial(_embed_norm_kernel, scale=scale),
        out_shape=jax.ShapeDtypeStruct((B, S, E), jnp.float32),
    )(emb, pe, g, b)


def _expert_layer(x, lp, tag, *, nhead, add_tag):
    A, S, E = x.shape
    return pl.pallas_call(
        functools.partial(_expert_layer_kernel, nhead=nhead, add_tag=add_tag),
        out_shape=jax.ShapeDtypeStruct((A, S, E), jnp.float32),
    )(x, lp["n1_g"], lp["n1_b"], lp["in_w"], lp["in_b"], lp["out_w"], lp["out_b"],
      lp["gate_wx"], lp["gate_wa"], lp["gate_b"], lp["gn_g"], lp["gn_b"],
      lp["n2_g"], lp["n2_b"], lp["ff_w1"], lp["ff_b1"], lp["ff_w2"], lp["ff_b2"],
      tag)


@functools.partial(jax.jit, static_argnames=("nhead",))
def expert_apply(x, ep, *, nhead):
    """All layers of one expert on a stacked (A_e, S, E) group — one jit dispatch."""
    layers = ep["layers"]
    n = len(layers)
    for li, lp in enumerate(layers):
        x = _expert_layer(x, lp, ep["tag"], nhead=nhead, add_tag=(li == n - 1))
    return x


@functools.partial(jax.jit, static_argnames=("max_visits", "ne"))
def router_step(xa, visits_ext, rp, *, max_visits, ne):
    """Router + argmax + entropy + diversity-entropy in a single device step."""
    A = xa.shape[0]
    nout = rp["w2"].shape[1]
    ml, probs = pl.pallas_call(
        functools.partial(_router_kernel, max_visits=max_visits),
        out_shape=(jax.ShapeDtypeStruct((A, nout), jnp.float32),
                   jax.ShapeDtypeStruct((A, nout), jnp.float32)),
    )(xa, visits_ext, rp["w1"], rp["b1"], rp["w2"], rp["b2"],
      rp["q_values"], rp["n_g"], rp["n_b"])
    actions = jnp.argmax(ml, axis=1).astype(jnp.int32)
    ent = (-jnp.sum(probs * jnp.log(probs + 1e-10), axis=1)).mean()
    avg = jnp.mean(probs[:, :ne], axis=0)
    div_ent = -jnp.sum(avg * jnp.log(avg + 1e-10))
    return actions, ent, div_ent


def final_head(final_repr, g, b, w_pad, b_pad):
    B = final_repr.shape[0]
    vpad = w_pad.shape[1]
    return pl.pallas_call(
        _final_head_kernel,
        out_shape=jax.ShapeDtypeStruct((B, vpad), jnp.float32),
    )(final_repr, g, b, w_pad, b_pad)


# ------------------------------ parameter init ------------------------------

def init_params(key, vocab_size, embed_dim, num_experts, expert_nhead,
                expert_dim_feedforward, expert_layers, router_hidden_dim, max_seq):
    keys = iter(jax.random.split(key, 4096))

    def nxt():
        return next(keys)

    def lin(fan_in, fan_out):
        bound = 1.0 / math.sqrt(fan_in)
        w = jax.random.uniform(nxt(), (fan_in, fan_out), jnp.float32, -bound, bound)
        b = jax.random.uniform(nxt(), (1, fan_out), jnp.float32, -bound, bound)
        return w, b

    def ones(n):
        return jnp.ones((1, n), jnp.float32)

    def zeros(n):
        return jnp.zeros((1, n), jnp.float32)

    E, FF, H = embed_dim, expert_dim_feedforward, router_hidden_dim

    emb = jax.random.normal(nxt(), (vocab_size, E), jnp.float32)
    emb = emb.at[0].set(0.0)  # padding_idx=0

    # sinusoidal positional encoding buffer (PositionalEncoding)
    pos = np.arange(max_seq, dtype=np.float32)[:, None]
    div = np.exp(np.arange(0, E, 2, dtype=np.float32) * (-math.log(10000.0) / E))
    pe = np.zeros((max_seq, E), dtype=np.float32)
    pe[:, 0::2] = np.sin(pos * div)
    pe[:, 1::2] = np.cos(pos * div)

    experts = []
    for _ in range(num_experts):
        layers = []
        for _ in range(expert_layers):
            in_w, in_b = lin(E, 3 * E)        # MHA in_proj (stored [in, out])
            out_w, out_b = lin(E, E)          # MHA out_proj
            gate_w, gate_b = lin(2 * E, E)    # GatedAttention.gate (pre-split)
            ff_w1, ff_b1 = lin(E, FF)
            ff_w2, ff_b2 = lin(FF, E)
            layers.append(dict(
                n1_g=ones(E), n1_b=zeros(E),
                in_w=in_w, in_b=in_b, out_w=out_w, out_b=out_b,
                gate_wx=gate_w[:E], gate_wa=gate_w[E:], gate_b=gate_b,
                gn_g=ones(E), gn_b=zeros(E),
                n2_g=ones(E), n2_b=zeros(E),
                ff_w1=ff_w1, ff_b1=ff_b1, ff_w2=ff_w2, ff_b2=ff_b2,
            ))
        tag = 0.01 * jax.random.normal(nxt(), (1, E), jnp.float32)
        experts.append(dict(layers=layers, tag=tag))

    r_w1, r_b1 = lin(E, H)
    r_w2, r_b2 = lin(H, num_experts + 1)
    router = dict(w1=r_w1, b1=r_b1, w2=r_w2, b2=r_b2,
                  n_g=ones(num_experts + 1), n_b=zeros(num_experts + 1),
                  q_values=zeros(num_experts + 1))

    lm_w, lm_b = lin(E, vocab_size)
    vpad = ((vocab_size + 127) // 128) * 128   # lane-dense LM-head output
    lm_w_pad = jnp.zeros((E, vpad), jnp.float32).at[:, :vocab_size].set(lm_w)
    lm_b_pad = jnp.zeros((1, vpad), jnp.float32).at[:, :vocab_size].set(lm_b)

    return dict(
        embed_dim=E, num_experts=num_experts, nhead=expert_nhead,
        vocab_size=vocab_size,
        embedding=emb, pe=jnp.asarray(pe),
        in_norm_g=ones(E), in_norm_b=zeros(E),
        final_norm_g=ones(E), final_norm_b=zeros(E),
        experts=experts, router=router,
        lm_w=lm_w_pad, lm_b=lm_b_pad,
    )


# ------------------------------ GoE forward ---------------------------------

def goe_forward(params, input_ids, max_path_len, max_visits_per_expert):
    input_ids = np.asarray(input_ids)
    B, S = input_ids.shape
    E = params["embed_dim"]
    ne = params["num_experts"]
    nhead = params["nhead"]
    V = params["vocab_size"]

    # embedding * sqrt(E) + positional encoding + input LayerNorm (one fused kernel)
    emb = params["embedding"][jnp.asarray(input_ids)]             # (B,S,E) gather
    pe = params["pe"][:S][None, :, :]                             # (1,S,E)
    x = embed_norm(emb, pe, params["in_norm_g"], params["in_norm_b"], math.sqrt(E))

    total_ent = jnp.float32(0.0)
    total_div = jnp.float32(0.0)
    paths = [[] for _ in range(B)]
    visits = np.zeros((B, ne), dtype=np.int64)
    expert_usage = collections.Counter()

    reprs = [x[i] for i in range(B)]         # per-sample (S,E) device arrays (lazy)
    final_slot = list(reprs)                 # == final_repr = x.clone()
    active = list(range(B))

    # TODO(synk): training-only branches (gumbel-softmax routing, Q/contrastive/
    # path/meta losses, RunningStat, animation signals) are not exercised in the
    # eval-mode forward and are intentionally omitted (they evaluate to 0 / no-op).
    for _ in range(max_path_len):
        if not active:
            break
        A = len(active)
        xa = jnp.stack([reprs[i] for i in active], axis=0)        # (A,S,E)

        # visit counts (extended with an always-unmasked terminate column)
        vext = np.zeros((A, ne + 1), dtype=np.int32)
        vext[:, :ne] = visits[active]

        actions, ent, div_ent = router_step(
            xa, jnp.asarray(vext), params["router"],
            max_visits=max_visits_per_expert, ne=ne)

        # diversity loss: usage term uses host counts from previous steps
        tot_u = sum(expert_usage.values()) + 1e-10
        usage = np.array([expert_usage.get(i, 0) / tot_u for i in range(ne)],
                         dtype=np.float32)
        lb_var = float(np.var(usage, ddof=1))        # torch.var default (unbiased)
        total_ent = total_ent + ent
        total_div = total_div + (-div_ent + 0.1 * lb_var)

        actions_np = np.asarray(actions)             # the single host sync per step

        groups = collections.defaultdict(list)
        for pos, orig in enumerate(active):
            a = int(actions_np[pos])
            if a == ne:                              # terminate
                paths[orig].append('T')
                final_slot[orig] = reprs[orig]
            else:
                paths[orig].append(a)
                visits[orig, a] += 1
                expert_usage[a] += 1
                groups[a].append((pos, orig))

        if not groups:
            active = []
            break

        new_active = []
        for e, members in sorted(groups.items()):
            rows = jnp.asarray(np.array([p for p, _ in members], dtype=np.int32))
            xg = jnp.take(xa, rows, axis=0)                        # (A_e,S,E)
            yg = expert_apply(xg, params["experts"][e], nhead=nhead)
            for j, (_, orig) in enumerate(members):
                reprs[orig] = yg[j]
                new_active.append(orig)
        active = new_active

    for orig in active:
        paths[orig].append('T_max')
        final_slot[orig] = reprs[orig]

    final_repr = jnp.stack(final_slot, axis=0)                     # (B,S,E) one stack
    logits_pad = final_head(final_repr, params["final_norm_g"],
                            params["final_norm_b"], params["lm_w"], params["lm_b"])
    logits = logits_pad[:, :V]

    # eval mode: path/meta/contrastive/Q losses are all zero
    aux = DIVERSITY_LOSS_COEF * total_div
    return logits, total_ent, paths, aux


# ---------------------------------- main -------------------------------------

if __name__ == "__main__":
    key = jax.random.PRNGKey(0)
    kp, kd = jax.random.split(key)

    vocab_size, embed_dim, num_experts = 50, 32, 3
    expert_nhead, expert_dim_feedforward, expert_layers = 4, 64, 2
    router_hidden_dim, max_path_len, max_visits_per_expert = 32, 3, 2
    B, S = 2, 8

    params = init_params(kp, vocab_size, embed_dim, num_experts, expert_nhead,
                         expert_dim_feedforward, expert_layers, router_hidden_dim,
                         max_seq=64)
    input_ids = jax.random.randint(kd, (B, S), 1, vocab_size, dtype=jnp.int32)

    logits, total_ent, paths, aux = goe_forward(
        params, input_ids, max_path_len, max_visits_per_expert)
    jax.block_until_ready((logits, total_ent, aux))

    assert logits.shape == (B, vocab_size)
    assert len(paths) == B
    print("KERNEL_OK")
</pallas_src>

<mosaic_0001>
module attributes {stable_mosaic.version = 11 : i64} {
  func.func @_embed_norm_kernel(%arg0: memref<2x8x32xf32, #tpu.memory_space<vmem>>, %arg1: memref<1x8x32xf32, #tpu.memory_space<vmem>>, %arg2: memref<1x32xf32, #tpu.memory_space<vmem>>, %arg3: memref<1x32xf32, #tpu.memory_space<vmem>>, %arg4: memref<2x8x32xf32, #tpu.memory_space<vmem>>) attributes {dimension_semantics = [], scalar_prefetch = 0 : i64, scratch_operands = 0 : i64, tpu.core_type = #tpu.core_type<tc>} {
    %c0 = arith.constant 0 : index
    %c0_0 = arith.constant 0 : index
    %c0_1 = arith.constant 0 : index
    %0 = vector.load %arg0[%c0, %c0_0, %c0_1] : memref<2x8x32xf32, #tpu.memory_space<vmem>>, vector<2x8x32xf32>
    %cst = arith.constant 5.65685415 : f32
    %1 = vector.broadcast %cst : f32 to vector<2x8x32xf32>
    %2 = arith.mulf %0, %1 : vector<2x8x32xf32>
    %c0_2 = arith.constant 0 : index
    %c0_3 = arith.constant 0 : index
    %c0_4 = arith.constant 0 : index
    %3 = vector.load %arg1[%c0_2, %c0_3, %c0_4] : memref<1x8x32xf32, #tpu.memory_space<vmem>>, vector<1x8x32xf32>
    %4 = vector.broadcast %3 : vector<1x8x32xf32> to vector<2x8x32xf32>
    %5 = arith.addf %2, %4 : vector<2x8x32xf32>
    %6 = vector.shape_cast %5 : vector<2x8x32xf32> to vector<16x32xf32>
    %c0_5 = arith.constant 0 : index
    %c0_6 = arith.constant 0 : index
    %7 = vector.load %arg2[%c0_5, %c0_6] : memref<1x32xf32, #tpu.memory_space<vmem>>, vector<1x32xf32>
    %c0_7 = arith.constant 0 : index
    %c0_8 = arith.constant 0 : index
    %8 = vector.load %arg3[%c0_7, %c0_8] : memref<1x32xf32, #tpu.memory_space<vmem>>, vector<1x32xf32>
    %cst_9 = arith.constant dense<0.000000e+00> : vector<16xf32>
    %9 = vector.multi_reduction <add>, %6, %cst_9 [1] : vector<16x32xf32> to vector<16xf32>
    %10 = vector.shape_cast %9 : vector<16xf32> to vector<16x1xf32>
    %cst_10 = arith.constant 3.200000e+01 : f32
    %11 = vector.broadcast %cst_10 : f32 to vector<16x1xf32>
    %12 = arith.divf %10, %11 : vector<16x1xf32>
    %13 = vector.broadcast %12 : vector<16x1xf32> to vector<16x32xf32>
    %14 = arith.subf %6, %13 : vector<16x32xf32>
    %15 = arith.mulf %14, %14 : vector<16x32xf32>
    %cst_11 = arith.constant dense<0.000000e+00> : vector<16xf32>
    %16 = vector.multi_reduction <add>, %15, %cst_11 [1] : vector<16x32xf32> to vector<16xf32>
    %17 = vector.shape_cast %16 : vector<16xf32> to vector<16x1xf32>
    %cst_12 = arith.constant 3.200000e+01 : f32
    %18 = vector.broadcast %cst_12 : f32 to vector<16x1xf32>
    %19 = arith.divf %17, %18 : vector<16x1xf32>
    %20 = vector.broadcast %12 : vector<16x1xf32> to vector<16x32xf32>
    %21 = arith.subf %6, %20 : vector<16x32xf32>
    %cst_13 = arith.constant 9.99999974E-6 : f32
    %22 = vector.broadcast %cst_13 : f32 to vector<16x1xf32>
    %23 = arith.addf %19, %22 : vector<16x1xf32>
    %24 = math.rsqrt %23 : vector<16x1xf32>
    %25 = vector.broadcast %24 : vector<16x1xf32> to vector<16x32xf32>
    %26 = arith.mulf %21, %25 : vector<16x32xf32>
    %27 = vector.broadcast %7 : vector<1x32xf32> to vector<16x32xf32>
    %28 = arith.mulf %26, %27 : vector<16x32xf32>
    %29 = vector.broadcast %8 : vector<1x32xf32> to vector<16x32xf32>
    %30 = arith.addf %28, %29 : vector<16x32xf32>
    %31 = vector.shape_cast %30 : vector<16x32xf32> to vector<2x8x32xf32>
    %c0_14 = arith.constant 0 : index
    %c0_15 = arith.constant 0 : index
    %c0_16 = arith.constant 0 : index
    %32 = vector.load %arg4[%c0_14, %c0_15, %c0_16] : memref<2x8x32xf32, #tpu.memory_space<vmem>>, vector<2x8x32xf32>
    tpu.vector_store %arg4[%c0_14, %c0_15, %c0_16], %31 {strides = array<i32>} : memref<2x8x32xf32, #tpu.memory_space<vmem>>, vector<2x8x32xf32>,
    return
  }
}

</mosaic_0001>

<bundles_post_ra>
// kernel: tpu_custom_call.1
= control target key start
LH: loop header
LB: loop body
LE: loop exit
PB: predicated region body
PF: predicated region fallthrough
CT: control target
= control target key end

     0   :  { %9 = vsyncpa [#allocation3], 0  ;;  %s251_s0 = inlined_call_operand.hbm [shape: f32[2,8,32], index: 0, kind: input, shape index: {}]   ;;  %s252_s1 = inlined_call_operand.hbm [shape: f32[1,8,32], index: 1, kind: input, shape index: {}]   ;;  %s253_s2 = inlined_call_operand.vmem [shape: f32[1,32], index: 2, kind: input, shape index: {}]   ;;  %s254_s3 = inlined_call_operand.vmem [shape: f32[1,32], index: 3, kind: input, shape index: {}]   ;;  %s255_s4 = inlined_call_operand.hbm [shape: f32[2,8,32], index: 4, kind: output, shape index: {}]  }
   0x1   :  { %10 = vsyncpa [#allocation6], 0 }
   0x2   :  { %11 = vsyncpa [#allocation4], 0  ;;  %s194_s15 = smov [#allocation2]  }
   0x3   :  { %s17_s16 = sshll.u32 %s194_s15, 4  ;;  %s18_s16 = int_to_ptr.vmem [resolvable:$true] %s17_s16 }
   0x4   :  { %s136_s17 = scalar_lea.vmem %s18_s16, 256  ;;  %p141_p1 = scmp.lt.s32.totalorder %s18_s16, %s18_s16 }
   0x5   :  { %p137_p0 = scmp.ne.s32.totalorder %s18_s16, %s136_s17  ;;  %p142_p2 = scmp.lt.s32.totalorder %s136_s17, %s136_s17 }
   0x7   :  { %p143_p3 = por %p142_p2, %p141_p1 }
   0x9   :  { %p144_p4 = pnand %p143_p3, %p137_p0 }
   0xb   :  { %147 = shalt.err (!%p144_p4)
}
   0xc   :  { %s195_s18 = smov 128   ;;  %s196_s19 = smov 8  }
   0xd   :  { %23 = dma.hbm_to_vmem [thread:$0]  %s251_s0, 256, %s18_s16, [#allocation3], %s195_s18, %s195_s18, %s196_s19  }
   0xe   :  { %s197_s22 = smov [#allocation5]  }
   0xf   :  { %s30_s23 = sshll.u32 %s197_s22, 4  ;;  %s31_s23 = int_to_ptr.vmem [resolvable:$true] %s30_s23 }
  0x10   :  { %s156_s24 = scalar_lea.vmem %s31_s23, 128  ;;  %p161_p6 = scmp.lt.s32.totalorder %s31_s23, %s31_s23 }
  0x11   :  { %p157_p5 = scmp.ne.s32.totalorder %s31_s23, %s156_s24  ;;  %p162_p7 = scmp.lt.s32.totalorder %s156_s24, %s156_s24 }
  0x13   :  { %p163_p8 = por %p162_p7, %p161_p6 }
  0x15   :  { %p164_p9 = pnand %p163_p8, %p157_p5 }
  0x17   :  { %167 = shalt.err (!%p164_p9)
}
  0x18   :  { %33 = dma.hbm_to_vmem [thread:$0]  %s252_s1, 128, %s31_s23, [#allocation6]  }
  0x19   :  { %188 = dma.done.wait [#allocation3], 256  }
  0x1a   :  { %189 = vsyncadd [#allocation3], 4294967040 }
  0x1b   :  { %190 = dma.done.wait [#allocation6], 128  }
  0x1c   :  { %191 = vsyncadd [#allocation6], 4294967168  ;;  %v44_v0 = vld [vmem:[#allocation2] sm:$0xff]  ;;  %v48_v1 = vld [vmem:[#allocation5] sm:$0xff]  ;;  %vm53_vm0 = vcmask 261120   ;;  %s198_s29 = smov [#allocation7]  }
  0x1d   :  { %v45_v2 = vld [vmem:[#allocation2 + $0x8] sm:$0xff]  ;;  %v46_v3 = vmul.f32 5.656854, %v44_v0  ;;  %v117_v26 = vld [vmem:[%s253_s2] ss:$0 sm:$0xff]  ;;  %s104_s30 = sshll.u32 %s198_s29, 4  ;;  %s105_s30 = int_to_ptr.vmem [resolvable:$true] %s104_s30 }
  0x1e   :  { %v47_v4 = vmul.f32 5.656854, %v45_v2  ;;  %v118_v28 = vld [vmem:[%s254_s3] ss:$0 sm:$0xff]  ;;  %s168_s5 = scalar_lea.vmem %s105_s30, 256  ;;  %p173_p11 = scmp.lt.s32.totalorder %s105_s30, %s105_s30 }
  0x1f   :  { %v49_v5 = vadd.f32 %v48_v1, %v46_v3  ;;  %p169_p10 = scmp.ne.s32.totalorder %s105_s30, %s168_s5  ;;  %p174_p12 = scmp.lt.s32.totalorder %s168_s5, %s168_s5 }
  0x20   :  { %v50_v6 = vadd.f32 %v48_v1, %v47_v4 }
  0x21   :  { %v54_v7 = vsel %vm53_vm0, %v49_v5, 0.0  ;;  %p175_p13 = por %p174_p12, %p173_p11 }
  0x22   :  { %55 = vadd.xlane.f32.xlu0 %v54_v7  ;;  %v57_v8 = vsel %vm53_vm0, %v50_v6, 0.0 }
  0x23   :  { %p176_p0 = pnand %p175_p13, %p169_p10 }
  0x26   :  { %58 = vadd.xlane.f32.xlu0 %v57_v8 }
  0xab   :  { %v56_v9 = vpop.xlane.xlu0 %55 }
  0xac   :  { %v61_v10 = vmul.f32 0.03125, %v56_v9 }
  0xae   :  { %v63_v11 = vsub.f32 %v49_v5, %v61_v10 }
  0xaf   :  { %v59_v12 = vpop.xlane.xlu0 %58 }
  0xb0   :  { %v62_v13 = vmul.f32 0.03125, %v59_v12  ;;  %v65_v14 = vmul.f32 %v63_v11, %v63_v11 }
  0xb2   :  { %v64_v15 = vsub.f32 %v50_v6, %v62_v13  ;;  %v67_v16 = vsel %vm53_vm0, %v65_v14, 0.0 }
  0xb3   :  { %68 = vadd.xlane.f32.xlu1 %v67_v16 }
  0xb4   :  { %v66_v17 = vmul.f32 %v64_v15, %v64_v15 }
  0xb6   :  { %v70_v18 = vsel %vm53_vm0, %v66_v17, 0.0 }
  0xb7   :  { %71 = vadd.xlane.f32.xlu1 %v70_v18 }
 0x13c   :  { %v69_v19 = vpop.xlane.xlu1 %68 }
 0x13d   :  { %v73_v20 = vmul.f32 0.03125, %v69_v19 }
 0x13f   :  { %v75_v21 = vadd.f32 1e-05, %v73_v20 }
 0x140   :  { %v72_v22 = vpop.xlane.xlu1 %71 }
 0x141   :  { %124 = vrsqrt.f32 %v75_v21  ;;  %v74_v23 = vmul.f32 0.03125, %v72_v22 }
 0x143   :  { %v76_v24 = vadd.f32 1e-05, %v74_v23 }
 0x145   :  { %126 = vrsqrt.f32 %v76_v24 }
 0x14e   :  { %v125_v25 = vpop.eup %124 }
 0x14f   :  { %v79_v27 = vmul.f32 %v125_v25, %v63_v11 }
 0x151   :  { %v87_v29 = vmul.f32 %v117_v26, %v79_v27 }
 0x152   :  { %v127_v30 = vpop.eup %126 }
 0x153   :  { %v80_v31 = vmul.f32 %v127_v30, %v64_v15  ;;  %v95_v32 = vadd.f32 %v118_v28, %v87_v29 }
 0x155   :  { %v88_v33 = vmul.f32 %v117_v26, %v80_v31  ;;  %97 = vst.msk [vmem:[#allocation7] sm:$0xff] %vm53_vm0, %v95_v32 }
 0x157   :  { %v96_v34 = vadd.f32 %v118_v28, %v88_v33 }
 0x159   :  { %98 = vst.msk [vmem:[#allocation7 + $0x8] sm:$0xff] %vm53_vm0, %v96_v34 }
 0x15a   :  { %179 = shalt.err (!%p176_p0)
}
 0x15b   :  { %110 = dma.vmem_to_hbm [thread:$0]  %s105_s30, 256, %s255_s4, [#allocation4], %s195_s18, %s195_s18, %s196_s19  }
 0x15c   :  { %192 = dma.done.wait [#allocation4], 256  }
 0x15d   :  { %193 = vsyncadd [#allocation4], 4294967040 }
 0x15e   :  { %114 = vsyncpa [#allocation3], 1 }
 0x15f   :  { %115 = vsyncpa [#allocation6], 1 }
 0x160   :  { %116 = vsyncpa [#allocation4], 1 }

</bundles_post_ra>
